<compile_context>
chip_gen: v6e
topology: v6e:2x2x1
jax: 0.10.0
libtpu: 0.0.40
codegen_flags: <defaults>
</compile_context>

<pallas_src>
import jax
import jax.numpy as jnp
from jax.experimental import pallas as pl
from jax.experimental.pallas import tpu as pltpu


def _standardize_kernel(x_ref, scale_ref, bias_ref, o_ref):
    # x_ref:     (rows, T)  tile of the flattened (B*C, T) input
    # scale_ref: (rows, 1)  per-row 1/std   (broadcasts across the lane axis)
    # bias_ref:  (rows, 1)  per-row mean/std
    o_ref[...] = (x_ref[...] * scale_ref[...] - bias_ref[...]).astype(o_ref.dtype)


def _choose_row_tile(num_rows, T, itemsize, target_bytes=2 << 20):
    """Pick a row-tile: ~target_bytes per block, multiple of 8 rows (f32 sublane)."""
    max_rows = max(1, target_bytes // max(1, T * itemsize))
    if max_rows >= num_rows:
        return num_rows                      # whole row axis in one block
    rows = max(8, (max_rows // 8) * 8)       # keep (8, 128) tiling legality
    if rows >= num_rows:
        return num_rows
    return rows


def standardize(x, mean, std, *, donate_x=False):
    """(x - mean) / std via a Pallas TPU kernel.

    x:    (B, C, T)
    mean: (C, 1) or (C,)   per-channel mean
    std:  (C, 1) or (C,)   per-channel std
    """
    B, C, T = x.shape
    R = B * C

    # Fold std into a reciprocal and mean into a bias, computed in float32
    # (matches PyTorch's .to(x) cast only at the very end).
    mean_f32 = jnp.reshape(mean, (C,)).astype(jnp.float32)
    std_f32 = jnp.reshape(std, (C,)).astype(jnp.float32)
    inv_std = 1.0 / std_f32                      # (C,)
    bias = mean_f32 * inv_std                    # (C,)

    # Broadcast per-channel stats to per-row (B*C, 1) vectors.
    scale_rows = jnp.broadcast_to(inv_std[None, :], (B, C)).reshape(R, 1).astype(x.dtype)
    bias_rows = jnp.broadcast_to(bias[None, :], (B, C)).reshape(R, 1).astype(x.dtype)

    x2 = x.reshape(R, T)

    rows = _choose_row_tile(R, T, x.dtype.itemsize)
    grid = (pl.cdiv(R, rows),)

    out2 = pl.pallas_call(
        _standardize_kernel,
        out_shape=jax.ShapeDtypeStruct((R, T), x.dtype),
        grid_spec=pltpu.PrefetchScalarGridSpec(
            num_scalar_prefetch=0,
            grid=grid,
            in_specs=[
                pl.BlockSpec((rows, T), lambda r: (r, 0)),   # x row tile
                pl.BlockSpec((rows, 1), lambda r: (r, 0)),   # 1/std per row
                pl.BlockSpec((rows, 1), lambda r: (r, 0)),   # mean/std per row
            ],
            out_specs=pl.BlockSpec((rows, T), lambda r: (r, 0)),
        ),
        compiler_params=pltpu.CompilerParams(
            dimension_semantics=("parallel",),
        ),
        input_output_aliases=({0: 0} if donate_x else {}),
    )(x2, scale_rows, bias_rows)

    return out2.reshape(B, C, T)


if __name__ == "__main__":
    key = jax.random.PRNGKey(0)
    kx, km, ks = jax.random.split(key, 3)

    B, C, T = 2, 4, 256  # small shapes; T is a multiple of 128 (lane axis)

    x = jax.random.normal(kx, (B, C, T), dtype=jnp.float32) * 3.0 + 1.5
    # Deterministic synthetic "module parameters" (per-channel statistics).
    mean = jax.random.normal(km, (C, 1), dtype=jnp.float32)
    std = jax.random.uniform(ks, (C, 1), dtype=jnp.float32, minval=0.5, maxval=2.0)

    out = standardize(x, mean, std)
    out = jax.block_until_ready(out)

    # Reference: the exact PyTorch-module semantics.
    ref = (x - mean[None, :, :]) / std[None, :, :]
    assert out.shape == x.shape and out.dtype == x.dtype
    # Tolerance accounts for the (x * (1/std) - mean/std) reformulation
    # (reciprocal rounding vs. a direct divide).
    assert jnp.allclose(out, ref, rtol=1e-5, atol=1e-5)

    print("KERNEL_OK")
</pallas_src>

<mosaic_0001>
module attributes {stable_mosaic.version = 11 : i64} {
  func.func @_standardize_kernel(%arg0: i32, %arg1: memref<8x256xf32, #tpu.memory_space<vmem>>, %arg2: memref<8x1xf32, #tpu.memory_space<vmem>>, %arg3: memref<8x1xf32, #tpu.memory_space<vmem>>, %arg4: memref<8x256xf32, #tpu.memory_space<vmem>>) attributes {dimension_semantics = [#tpu.dimension_semantics<parallel>], iteration_bounds = array<i64: 1>, scalar_prefetch = 0 : i64, scratch_operands = 0 : i64, tpu.core_type = #tpu.core_type<tc>, window_params = [{transform_indices = @transform_0, window_bounds = array<i64: 8, 256>}, {transform_indices = @transform_1, window_bounds = array<i64: 8, 1>}, {transform_indices = @transform_2, window_bounds = array<i64: 8, 1>}, {transform_indices = @transform_3, window_bounds = array<i64: 8, 256>}]} {
    %c0 = arith.constant 0 : index
    %c0_0 = arith.constant 0 : index
    %0 = vector.load %arg1[%c0, %c0_0] : memref<8x256xf32, #tpu.memory_space<vmem>>, vector<8x256xf32>
    %c0_1 = arith.constant 0 : index
    %c0_2 = arith.constant 0 : index
    %1 = vector.load %arg2[%c0_1, %c0_2] : memref<8x1xf32, #tpu.memory_space<vmem>>, vector<8x1xf32>
    %2 = vector.broadcast %1 : vector<8x1xf32> to vector<8x256xf32>
    %3 = arith.mulf %0, %2 : vector<8x256xf32>
    %c0_3 = arith.constant 0 : index
    %c0_4 = arith.constant 0 : index
    %4 = vector.load %arg3[%c0_3, %c0_4] : memref<8x1xf32, #tpu.memory_space<vmem>>, vector<8x1xf32>
    %5 = vector.broadcast %4 : vector<8x1xf32> to vector<8x256xf32>
    %6 = arith.subf %3, %5 : vector<8x256xf32>
    %c0_5 = arith.constant 0 : index
    %c0_6 = arith.constant 0 : index
    %7 = vector.load %arg4[%c0_5, %c0_6] : memref<8x256xf32, #tpu.memory_space<vmem>>, vector<8x256xf32>
    tpu.vector_store %arg4[%c0_5, %c0_6], %6 {strides = array<i32>} : memref<8x256xf32, #tpu.memory_space<vmem>>, vector<8x256xf32>,
    return
  }
  func.func @transform_0(%arg0: i32) -> (i32, i32) {
    %c0_i32 = arith.constant 0 : i32
    %c0_i32_0 = arith.constant 0 : i32
    return %arg0, %c0_i32 : i32, i32
  }
  func.func @transform_1(%arg0: i32) -> (i32, i32) {
    %c0_i32 = arith.constant 0 : i32
    %c0_i32_0 = arith.constant 0 : i32
    return %arg0, %c0_i32 : i32, i32
  }
  func.func @transform_2(%arg0: i32) -> (i32, i32) {
    %c0_i32 = arith.constant 0 : i32
    %c0_i32_0 = arith.constant 0 : i32
    return %arg0, %c0_i32 : i32, i32
  }
  func.func @transform_3(%arg0: i32) -> (i32, i32) {
    %c0_i32 = arith.constant 0 : i32
    %c0_i32_0 = arith.constant 0 : i32
    return %arg0, %c0_i32 : i32, i32
  }
}

</mosaic_0001>

<bundles_post_ra>
// kernel: tpu_custom_call.1
= control target key start
LH: loop header
LB: loop body
LE: loop exit
PB: predicated region body
PF: predicated region fallthrough
CT: control target
= control target key end

     0   :  { %v74_v1 = vmov 0   ;;  %s111_s0 = inlined_call_operand.vmem [shape: f32[8,256], index: 0, kind: input, shape index: {}]   ;;  %s112_s1 = inlined_call_operand.vmem [shape: f32[8,1], index: 1, kind: input, shape index: {}]   ;;  %s113_s2 = inlined_call_operand.vmem [shape: f32[8,1], index: 2, kind: input, shape index: {}]   ;;  %s114_s3 = inlined_call_operand.hbm [shape: f32[8,256], index: 3, kind: output, shape index: {}]  }
   0x1   :  { %v17_v0 = vld [vmem:[%s112_s1] sm:$0xff]  ;;  %51 = vset.pattern.permute.xlu0 %v74_v1 }
   0x2   :  { %8 = vsyncpa [#allocation3], 0  ;;  %20 = vperm.xlu0 %51, %v17_v0   ;;  %v25_v2 = vld [vmem:[%s113_s2] sm:$0xff]  ;;  %v16_v5 = vld [vmem:[%s111_s0 + $0x8] sm:$0xff]  ;;  %s75_s20 = smov [#allocation2]  }
   0x3   :  { %v15_v4 = vld [vmem:[%s111_s0] sm:$0xff]  ;;  %s41_s1 = sshll.u32 %s75_s20, 4  ;;  %s42_s1 = int_to_ptr.vmem [resolvable:$true] %s41_s1 }
   0x4   :  { %s52_s2 = scalar_lea.vmem %s42_s1, 256  ;;  %p57_p1 = scmp.lt.s32.totalorder %s42_s1, %s42_s1 }
   0x5   :  { %p53_p0 = scmp.ne.s32.totalorder %s42_s1, %s52_s2  ;;  %p58_p2 = scmp.lt.s32.totalorder %s52_s2, %s52_s2 }
   0x6   :  { %28 = vperm.xlu0 %51, %v25_v2  }
   0x7   :  { %p59_p3 = por %p58_p2, %p57_p1 }
   0x9   :  { %p60_p4 = pnand %p59_p3, %p53_p0 }
  0x7d   :  { %v21_v3 = vpop.permute.xlu0 %20 }
  0x7e   :  { %v23_v6 = vmul.f32 %v21_v3, %v15_v4  ;;  %v24_v7 = vmul.f32 %v21_v3, %v16_v5 }
  0x81   :  { %v29_v8 = vpop.permute.xlu0 %28 }
  0x82   :  { %v31_v9 = vsub.f32 %v23_v6, %v29_v8  ;;  %v32_v10 = vsub.f32 %v24_v7, %v29_v8 }
  0x84   :  { %33 = vst [vmem:[#allocation2] sm:$0xff] %v31_v9  ;;  %34 = vst [vmem:[#allocation2 + $0x8] sm:$0xff] %v32_v10 }
  0x85   :  { %63 = shalt.err (!%p60_p4)
}
  0x86   :  { %44 = dma.vmem_to_hbm [thread:$0]  %s42_s1, 256, %s114_s3, [#allocation3]  }
  0x87   :  { %72 = dma.done.wait [#allocation3], 256  }
  0x88   :  { %73 = vsyncadd [#allocation3], 4294967040 }
  0x89   :  { %48 = vsyncpa [#allocation3], 1 }

</bundles_post_ra>
